<compile_context>
chip_gen: v7x
topology: tpu7x:2x2x1
jax: 0.10.0
libtpu: 0.0.40
codegen_flags: <defaults>
</compile_context>

<pallas_src>
import math
import functools

import numpy as np
import jax
import jax.numpy as jnp
from jax.experimental import pallas as pl
from jax.experimental.pallas import tpu as pltpu


# ----------------------------------------------------------------------------
# Fused forward: reflect pad once, one pallas_call, NCHW recovery.
# ----------------------------------------------------------------------------
@functools.partial(jax.jit, static_argnames=("pmax",))
def segmentation_model_forward(x, w_mat, b_vec, *, pmax):
    """All four reflect-padded Gabor convs + bias + channel concat in one kernel."""
    N, Cin, H, W = x.shape
    # reflect-pad(pmax) cropped by (pmax - pK) == reflect-pad(pK) only if pmax <= H-1, W-1.
    assert pmax < H and pmax < W, "reflect-crop equivalence requires pmax < H and pmax < W"

    Hp, Wp = H + 2 * pmax, W + 2 * pmax
    ndh = 2 * pmax + 1                       # vertical taps covering every K in the bank
    T = Cin * ndh * Wp                       # real contraction length (286 here)
    Tpad, CoutW = w_mat.shape                # contraction rounded to 128; Cout*W lanes
    Cout = CoutW // W
    assert Tpad >= T and Cout * W == CoutW

    # Images per grid step: target ~128 MXU rows (NB*H) per step.  128 (not 256) keeps
    # >=2 grid blocks sooner for v7x's two TensorCores when N*H is small.
    NB = max(1, min(N, max(1, 128 // H)))
    while N % NB:                            # keep the grid exact
        NB -= 1
    grid = (N // NB,)

    # Single reflect pad at the maximum support size; bf16 for native MXU passes and
    # half the input DMA bytes.  (N, Cin, Hp, Wp) -> (N, Cin*Hp, Wp) is a free reshape.
    xp = jnp.pad(x, ((0, 0), (0, 0), (pmax, pmax), (pmax, pmax)), mode="reflect")
    xp = xp.reshape(N, Cin * Hp, Wp).astype(jnp.bfloat16)

    def kernel(x_ref, w_ref, b_ref, o_ref, lhs_ref):
        # x_ref : (NB, Cin*Hp, Wp)  bf16   reflect-padded images (no HBM duplication)
        # w_ref : (Tpad, Cout*W)    bf16   banded Gabor weight matrix, grid-resident
        # b_ref : (1, Cout*W)       f32    per-output-channel bias, broadcast over W
        # o_ref : (NB, H, Cout*W)   f32    lane-dense output
        # lhs_ref: (NB*H, Tpad)     bf16   VMEM scratch holding the banded/Toeplitz LHS
        if Tpad > T:
            # Weight rows [T:Tpad) are zero, but uninitialized VMEM could hold NaNs and
            # NaN*0 = NaN, so zero the dead contraction tail explicitly (tiny VPU cost).
            lhs_ref[:, T:Tpad] = jnp.zeros((NB * H, Tpad - T), lhs_ref.dtype)
        # Build the row-shifted LHS in VMEM:  lhs[nb*H+h, (ci*ndh+dh)*Wp + c]
        #   = xp[nb, ci, dh+h, c].  Static slices -> cheap vector copies, all in VMEM.
        for nb in range(NB):
            for ci in range(Cin):
                for dh in range(ndh):
                    col = (ci * ndh + dh) * Wp
                    lhs_ref[nb * H:(nb + 1) * H, col:col + Wp] = \
                        x_ref[nb, ci * Hp + dh: ci * Hp + dh + H, :]
        # One MXU matmul per grid step: (NB*H, Tpad) @ (Tpad, Cout*W), f32 accumulate.
        acc = jnp.dot(lhs_ref[...], w_ref[...], preferred_element_type=jnp.float32)
        acc = acc + b_ref[...]                               # bias epilogue (VPU, f32)
        for nb in range(NB):
            o_ref[nb] = acc[nb * H:(nb + 1) * H, :]          # unmasked 256-lane stores

    out = pl.pallas_call(
        kernel,
        out_shape=jax.ShapeDtypeStruct((N, H, CoutW), jnp.float32),
        grid=grid,
        in_specs=[
            pl.BlockSpec((NB, Cin * Hp, Wp), lambda n: (n, 0, 0)),   # NB padded images
            pl.BlockSpec((Tpad, CoutW), lambda n: (0, 0)),           # weights resident
            pl.BlockSpec((1, CoutW), lambda n: (0, 0)),              # bias resident
        ],
        out_specs=pl.BlockSpec((NB, H, CoutW), lambda n: (n, 0, 0)),
        scratch_shapes=[pltpu.VMEM((NB * H, Tpad), jnp.bfloat16)],
        compiler_params=pltpu.CompilerParams(
            dimension_semantics=("parallel",),               # batch blocks over TCs
        ),
    )(xp, w_mat, b_vec)

    # (N, H, Cout*W) -> (N, Cout, H, W); channel order matches torch.cat((c5,c7,c9,c11),1).
    y = out.reshape(N, H, Cout, W).transpose(0, 2, 1, 3)
    return y


# ----------------------------------------------------------------------------
# Deterministic parameter construction (mirrors setGaborfiltersValues).
# ----------------------------------------------------------------------------
def gabor_bank(K, thetas, frequency=1.0 / 8.0, sigma=3.0):
    half = math.floor(K / 2)
    r = np.arange(-half, math.ceil(K / 2), dtype=np.float32)
    gx, gy = np.meshgrid(r, r, indexing="ij")       # torch.meshgrid default 'ij'
    filts = []
    for th in thetas:                               # degree-valued thetas used as radians (as in reference)
        F = (np.cos(2.0 * 3.1415 * frequency * (gx * np.cos(th) + gy * np.sin(th)))
             * np.exp(-(gx * gx + gy * gy) / (2.0 * sigma * sigma)))
        F = F / np.linalg.norm(F)
        filts.append(F)
    return np.stack(filts).astype(np.float32)       # (nTheta, K, K)


def build_params(ncIn, nGaborFilters, ngf, supportSizes, key):
    per = nGaborFilters // len(supportSizes)
    thetas = np.linspace(0.0, 180.0, ngf // len(supportSizes)).astype(np.float32)
    params = {}
    for K in supportSizes:
        key, kb = jax.random.split(key)
        w = np.zeros((per, ncIn, K, K), dtype=np.float32)
        w[:, 0, :, :] = gabor_bank(K, thetas)[:per]  # reference only overwrites input channel 0 (ncIn == 1)
        bound = 1.0 / math.sqrt(ncIn * K * K)
        b = jax.random.uniform(kb, (per,), jnp.float32, minval=-bound, maxval=bound)
        params[K] = (jnp.asarray(w), b)
    return params


def build_fused_weight_matrix(params, supportSizes, ncIn, W, pmax):
    """Banded matrix Wmat[Tpad, Cout*W] (bf16) and bias row b[1, Cout*W] (f32) such that
    (row-shifted padded rows) @ Wmat + b == fused conv + bias + channel concat."""
    Wp = W + 2 * pmax
    ndh = 2 * pmax + 1
    T = ncIn * ndh * Wp
    Tpad = ((T + 127) // 128) * 128                 # round contraction to 128 lanes
    Cout = sum(int(params[K][0].shape[0]) for K in supportSizes)
    w_mat = np.zeros((Tpad, Cout * W), np.float32)
    b_vec = np.zeros((1, Cout * W), np.float32)

    ws = np.arange(W)
    o_base = 0
    for K in supportSizes:                          # channel order == torch.cat((c5, c7, c9, c11), 1)
        w_np = np.asarray(params[K][0])             # (perK, ncIn, K, K)
        b_np = np.asarray(params[K][1])             # (perK,)
        pK = (K - 1) // 2
        off = pmax - pK                             # crop offset inside the p_max-padded image
        perK = w_np.shape[0]
        for oo in range(perK):
            o = o_base + oo
            cols = o * W + ws
            for ci in range(ncIn):
                for kh in range(K):
                    dh = off + kh
                    row_base = (ci * ndh + dh) * Wp
                    for kw in range(K):
                        rows = row_base + off + kw + ws
                        w_mat[rows, cols] += w_np[oo, ci, kh, kw]
            b_vec[0, cols] = b_np[oo]
        o_base += perK
    return jnp.asarray(w_mat, dtype=jnp.bfloat16), jnp.asarray(b_vec, dtype=jnp.float32)


# ----------------------------------------------------------------------------
if __name__ == "__main__":
    # Small, forward-consistent config: ncIn=1, nGaborFilters=ngf=16, 4 support sizes.
    ncIn, ncOut, ngf, nGaborFilters = 1, 1, 16, 16
    supportSizes = [5, 7, 9, 11]
    N, H, W = 2, 16, 16

    key = jax.random.PRNGKey(0)
    kx, kp = jax.random.split(key)
    x = jax.random.normal(kx, (N, ncIn, H, W), jnp.float32)

    params = build_params(ncIn, nGaborFilters, ngf, supportSizes, kp)
    pmax = (max(supportSizes) - 1) // 2
    w_mat, b_vec = build_fused_weight_matrix(params, supportSizes, ncIn, W, pmax)

    y = segmentation_model_forward(x, w_mat, b_vec, pmax=pmax)
    y = jax.block_until_ready(y)
    assert y.shape == (N, nGaborFilters, H, W), y.shape

    # Sanity check against XLA's f32 conv on the per-K reflect-padded input.
    # Kernel runs bf16 inputs/weights with f32 accumulation -> 2e-2 tolerance.
    refs = []
    for K in supportSizes:
        w, b = params[K]
        p = (K - 1) // 2
        xp = jnp.pad(x, ((0, 0), (0, 0), (p, p), (p, p)), mode="reflect")
        r = jax.lax.conv_general_dilated(
            xp, w, window_strides=(1, 1), padding="VALID",
            dimension_numbers=("NCHW", "OIHW", "NCHW"),
            precision=jax.lax.Precision.HIGHEST)
        refs.append(r + b[None, :, None, None])
    y_ref = jnp.concatenate(refs, axis=1)
    np.testing.assert_allclose(np.asarray(y), np.asarray(y_ref), rtol=2e-2, atol=2e-2)

    print("KERNEL_OK")
</pallas_src>

<mosaic_0001>
module attributes {stable_mosaic.version = 11 : i64} {
  func.func @kernel(%arg0: i32, %arg1: memref<2x26x26xbf16, #tpu.memory_space<vmem>>, %arg2: memref<384x256xbf16, #tpu.memory_space<vmem>>, %arg3: memref<1x256xf32, #tpu.memory_space<vmem>>, %arg4: memref<2x16x256xf32, #tpu.memory_space<vmem>>, %arg5: memref<32x384xbf16, #tpu.memory_space<vmem>>) attributes {dimension_semantics = [#tpu.dimension_semantics<parallel>], iteration_bounds = array<i64: 1>, scalar_prefetch = 0 : i64, scratch_operands = 1 : i64, tpu.core_type = #tpu.core_type<tc>, window_params = [{transform_indices = @transform_0, window_bounds = array<i64: 2, 26, 26>}, {pipeline_mode = #tpu.pipeline_mode<synchronous>, transform_indices = @transform_1, window_bounds = array<i64: 384, 256>}, {pipeline_mode = #tpu.pipeline_mode<synchronous>, transform_indices = @transform_2, window_bounds = array<i64: 1, 256>}, {transform_indices = @transform_3, window_bounds = array<i64: 2, 16, 256>}]} {
    %cst = arith.constant 0.000000e+00 : bf16
    %0 = vector.broadcast %cst : bf16 to vector<32x98xbf16>
    %c0 = arith.constant 0 : index
    %c286 = arith.constant 286 : index
    %1 = vector.load %arg5[%c0, %c286] : memref<32x384xbf16, #tpu.memory_space<vmem>>, vector<32x98xbf16>
    tpu.vector_store %arg5[%c0, %c286], %0 {strides = array<i32>} : memref<32x384xbf16, #tpu.memory_space<vmem>>, vector<32x98xbf16>,
    %c0_0 = arith.constant 0 : index
    %c0_1 = arith.constant 0 : index
    %c0_2 = arith.constant 0 : index
    %2 = vector.load %arg1[%c0_0, %c0_1, %c0_2] : memref<2x26x26xbf16, #tpu.memory_space<vmem>>, vector<1x16x26xbf16>
    %3 = vector.shape_cast %2 : vector<1x16x26xbf16> to vector<16x26xbf16>
    %c0_3 = arith.constant 0 : index
    %c0_4 = arith.constant 0 : index
    %4 = vector.load %arg5[%c0_3, %c0_4] : memref<32x384xbf16, #tpu.memory_space<vmem>>, vector<16x26xbf16>
    tpu.vector_store %arg5[%c0_3, %c0_4], %3 {strides = array<i32>} : memref<32x384xbf16, #tpu.memory_space<vmem>>, vector<16x26xbf16>,
    %c0_5 = arith.constant 0 : index
    %c1 = arith.constant 1 : index
    %c0_6 = arith.constant 0 : index
    %5 = vector.load %arg1[%c0_5, %c1, %c0_6] : memref<2x26x26xbf16, #tpu.memory_space<vmem>>, vector<1x16x26xbf16>
    %6 = vector.shape_cast %5 : vector<1x16x26xbf16> to vector<16x26xbf16>
    %c0_7 = arith.constant 0 : index
    %c26 = arith.constant 26 : index
    %7 = vector.load %arg5[%c0_7, %c26] : memref<32x384xbf16, #tpu.memory_space<vmem>>, vector<16x26xbf16>
    tpu.vector_store %arg5[%c0_7, %c26], %6 {strides = array<i32>} : memref<32x384xbf16, #tpu.memory_space<vmem>>, vector<16x26xbf16>,
    %c0_8 = arith.constant 0 : index
    %c2 = arith.constant 2 : index
    %c0_9 = arith.constant 0 : index
    %8 = vector.load %arg1[%c0_8, %c2, %c0_9] : memref<2x26x26xbf16, #tpu.memory_space<vmem>>, vector<1x16x26xbf16>
    %9 = vector.shape_cast %8 : vector<1x16x26xbf16> to vector<16x26xbf16>
    %c0_10 = arith.constant 0 : index
    %c52 = arith.constant 52 : index
    %10 = vector.load %arg5[%c0_10, %c52] : memref<32x384xbf16, #tpu.memory_space<vmem>>, vector<16x26xbf16>
    tpu.vector_store %arg5[%c0_10, %c52], %9 {strides = array<i32>} : memref<32x384xbf16, #tpu.memory_space<vmem>>, vector<16x26xbf16>,
    %c0_11 = arith.constant 0 : index
    %c3 = arith.constant 3 : index
    %c0_12 = arith.constant 0 : index
    %11 = vector.load %arg1[%c0_11, %c3, %c0_12] : memref<2x26x26xbf16, #tpu.memory_space<vmem>>, vector<1x16x26xbf16>
    %12 = vector.shape_cast %11 : vector<1x16x26xbf16> to vector<16x26xbf16>
    %c0_13 = arith.constant 0 : index
    %c78 = arith.constant 78 : index
    %13 = vector.load %arg5[%c0_13, %c78] : memref<32x384xbf16, #tpu.memory_space<vmem>>, vector<16x26xbf16>
    tpu.vector_store %arg5[%c0_13, %c78], %12 {strides = array<i32>} : memref<32x384xbf16, #tpu.memory_space<vmem>>, vector<16x26xbf16>,
    %c0_14 = arith.constant 0 : index
    %c4 = arith.constant 4 : index
    %c0_15 = arith.constant 0 : index
    %14 = vector.load %arg1[%c0_14, %c4, %c0_15] : memref<2x26x26xbf16, #tpu.memory_space<vmem>>, vector<1x16x26xbf16>
    %15 = vector.shape_cast %14 : vector<1x16x26xbf16> to vector<16x26xbf16>
    %c0_16 = arith.constant 0 : index
    %c104 = arith.constant 104 : index
    %16 = vector.load %arg5[%c0_16, %c104] : memref<32x384xbf16, #tpu.memory_space<vmem>>, vector<16x26xbf16>
    tpu.vector_store %arg5[%c0_16, %c104], %15 {strides = array<i32>} : memref<32x384xbf16, #tpu.memory_space<vmem>>, vector<16x26xbf16>,
    %c0_17 = arith.constant 0 : index
    %c5 = arith.constant 5 : index
    %c0_18 = arith.constant 0 : index
    %17 = vector.load %arg1[%c0_17, %c5, %c0_18] : memref<2x26x26xbf16, #tpu.memory_space<vmem>>, vector<1x16x26xbf16>
    %18 = vector.shape_cast %17 : vector<1x16x26xbf16> to vector<16x26xbf16>
    %c0_19 = arith.constant 0 : index
    %c130 = arith.constant 130 : index
    %19 = vector.load %arg5[%c0_19, %c130] : memref<32x384xbf16, #tpu.memory_space<vmem>>, vector<16x26xbf16>
    tpu.vector_store %arg5[%c0_19, %c130], %18 {strides = array<i32>} : memref<32x384xbf16, #tpu.memory_space<vmem>>, vector<16x26xbf16>,
    %c0_20 = arith.constant 0 : index
    %c6 = arith.constant 6 : index
    %c0_21 = arith.constant 0 : index
    %20 = vector.load %arg1[%c0_20, %c6, %c0_21] : memref<2x26x26xbf16, #tpu.memory_space<vmem>>, vector<1x16x26xbf16>
    %21 = vector.shape_cast %20 : vector<1x16x26xbf16> to vector<16x26xbf16>
    %c0_22 = arith.constant 0 : index
    %c156 = arith.constant 156 : index
    %22 = vector.load %arg5[%c0_22, %c156] : memref<32x384xbf16, #tpu.memory_space<vmem>>, vector<16x26xbf16>
    tpu.vector_store %arg5[%c0_22, %c156], %21 {strides = array<i32>} : memref<32x384xbf16, #tpu.memory_space<vmem>>, vector<16x26xbf16>,
    %c0_23 = arith.constant 0 : index
    %c7 = arith.constant 7 : index
    %c0_24 = arith.constant 0 : index
    %23 = vector.load %arg1[%c0_23, %c7, %c0_24] : memref<2x26x26xbf16, #tpu.memory_space<vmem>>, vector<1x16x26xbf16>
    %24 = vector.shape_cast %23 : vector<1x16x26xbf16> to vector<16x26xbf16>
    %c0_25 = arith.constant 0 : index
    %c182 = arith.constant 182 : index
    %25 = vector.load %arg5[%c0_25, %c182] : memref<32x384xbf16, #tpu.memory_space<vmem>>, vector<16x26xbf16>
    tpu.vector_store %arg5[%c0_25, %c182], %24 {strides = array<i32>} : memref<32x384xbf16, #tpu.memory_space<vmem>>, vector<16x26xbf16>,
    %c0_26 = arith.constant 0 : index
    %c8 = arith.constant 8 : index
    %c0_27 = arith.constant 0 : index
    %26 = vector.load %arg1[%c0_26, %c8, %c0_27] : memref<2x26x26xbf16, #tpu.memory_space<vmem>>, vector<1x16x26xbf16>
    %27 = vector.shape_cast %26 : vector<1x16x26xbf16> to vector<16x26xbf16>
    %c0_28 = arith.constant 0 : index
    %c208 = arith.constant 208 : index
    %28 = vector.load %arg5[%c0_28, %c208] : memref<32x384xbf16, #tpu.memory_space<vmem>>, vector<16x26xbf16>
    tpu.vector_store %arg5[%c0_28, %c208], %27 {strides = array<i32>} : memref<32x384xbf16, #tpu.memory_space<vmem>>, vector<16x26xbf16>,
    %c0_29 = arith.constant 0 : index
    %c9 = arith.constant 9 : index
    %c0_30 = arith.constant 0 : index
    %29 = vector.load %arg1[%c0_29, %c9, %c0_30] : memref<2x26x26xbf16, #tpu.memory_space<vmem>>, vector<1x16x26xbf16>
    %30 = vector.shape_cast %29 : vector<1x16x26xbf16> to vector<16x26xbf16>
    %c0_31 = arith.constant 0 : index
    %c234 = arith.constant 234 : index
    %31 = vector.load %arg5[%c0_31, %c234] : memref<32x384xbf16, #tpu.memory_space<vmem>>, vector<16x26xbf16>
    tpu.vector_store %arg5[%c0_31, %c234], %30 {strides = array<i32>} : memref<32x384xbf16, #tpu.memory_space<vmem>>, vector<16x26xbf16>,
    %c0_32 = arith.constant 0 : index
    %c10 = arith.constant 10 : index
    %c0_33 = arith.constant 0 : index
    %32 = vector.load %arg1[%c0_32, %c10, %c0_33] : memref<2x26x26xbf16, #tpu.memory_space<vmem>>, vector<1x16x26xbf16>
    %33 = vector.shape_cast %32 : vector<1x16x26xbf16> to vector<16x26xbf16>
    %c0_34 = arith.constant 0 : index
    %c260 = arith.constant 260 : index
    %34 = vector.load %arg5[%c0_34, %c260] : memref<32x384xbf16, #tpu.memory_space<vmem>>, vector<16x26xbf16>
    tpu.vector_store %arg5[%c0_34, %c260], %33 {strides = array<i32>} : memref<32x384xbf16, #tpu.memory_space<vmem>>, vector<16x26xbf16>,
    %c1_35 = arith.constant 1 : index
    %c0_36 = arith.constant 0 : index
    %c0_37 = arith.constant 0 : index
    %35 = vector.load %arg1[%c1_35, %c0_36, %c0_37] : memref<2x26x26xbf16, #tpu.memory_space<vmem>>, vector<1x16x26xbf16>
    %36 = vector.shape_cast %35 : vector<1x16x26xbf16> to vector<16x26xbf16>
    %c16 = arith.constant 16 : index
    %c0_38 = arith.constant 0 : index
    %37 = vector.load %arg5[%c16, %c0_38] : memref<32x384xbf16, #tpu.memory_space<vmem>>, vector<16x26xbf16>
    tpu.vector_store %arg5[%c16, %c0_38], %36 {strides = array<i32>} : memref<32x384xbf16, #tpu.memory_space<vmem>>, vector<16x26xbf16>,
    %c1_39 = arith.constant 1 : index
    %c1_40 = arith.constant 1 : index
    %c0_41 = arith.constant 0 : index
    %38 = vector.load %arg1[%c1_39, %c1_40, %c0_41] : memref<2x26x26xbf16, #tpu.memory_space<vmem>>, vector<1x16x26xbf16>
    %39 = vector.shape_cast %38 : vector<1x16x26xbf16> to vector<16x26xbf16>
    %c16_42 = arith.constant 16 : index
    %c26_43 = arith.constant 26 : index
    %40 = vector.load %arg5[%c16_42, %c26_43] : memref<32x384xbf16, #tpu.memory_space<vmem>>, vector<16x26xbf16>
    tpu.vector_store %arg5[%c16_42, %c26_43], %39 {strides = array<i32>} : memref<32x384xbf16, #tpu.memory_space<vmem>>, vector<16x26xbf16>,
    %c1_44 = arith.constant 1 : index
    %c2_45 = arith.constant 2 : index
    %c0_46 = arith.constant 0 : index
    %41 = vector.load %arg1[%c1_44, %c2_45, %c0_46] : memref<2x26x26xbf16, #tpu.memory_space<vmem>>, vector<1x16x26xbf16>
    %42 = vector.shape_cast %41 : vector<1x16x26xbf16> to vector<16x26xbf16>
    %c16_47 = arith.constant 16 : index
    %c52_48 = arith.constant 52 : index
    %43 = vector.load %arg5[%c16_47, %c52_48] : memref<32x384xbf16, #tpu.memory_space<vmem>>, vector<16x26xbf16>
    tpu.vector_store %arg5[%c16_47, %c52_48], %42 {strides = array<i32>} : memref<32x384xbf16, #tpu.memory_space<vmem>>, vector<16x26xbf16>,
    %c1_49 = arith.constant 1 : index
    %c3_50 = arith.constant 3 : index
    %c0_51 = arith.constant 0 : index
    %44 = vector.load %arg1[%c1_49, %c3_50, %c0_51] : memref<2x26x26xbf16, #tpu.memory_space<vmem>>, vector<1x16x26xbf16>
    %45 = vector.shape_cast %44 : vector<1x16x26xbf16> to vector<16x26xbf16>
    %c16_52 = arith.constant 16 : index
    %c78_53 = arith.constant 78 : index
    %46 = vector.load %arg5[%c16_52, %c78_53] : memref<32x384xbf16, #tpu.memory_space<vmem>>, vector<16x26xbf16>
    tpu.vector_store %arg5[%c16_52, %c78_53], %45 {strides = array<i32>} : memref<32x384xbf16, #tpu.memory_space<vmem>>, vector<16x26xbf16>,
    %c1_54 = arith.constant 1 : index
    %c4_55 = arith.constant 4 : index
    %c0_56 = arith.constant 0 : index
    %47 = vector.load %arg1[%c1_54, %c4_55, %c0_56] : memref<2x26x26xbf16, #tpu.memory_space<vmem>>, vector<1x16x26xbf16>
    %48 = vector.shape_cast %47 : vector<1x16x26xbf16> to vector<16x26xbf16>
    %c16_57 = arith.constant 16 : index
    %c104_58 = arith.constant 104 : index
    %49 = vector.load %arg5[%c16_57, %c104_58] : memref<32x384xbf16, #tpu.memory_space<vmem>>, vector<16x26xbf16>
    tpu.vector_store %arg5[%c16_57, %c104_58], %48 {strides = array<i32>} : memref<32x384xbf16, #tpu.memory_space<vmem>>, vector<16x26xbf16>,
    %c1_59 = arith.constant 1 : index
    %c5_60 = arith.constant 5 : index
    %c0_61 = arith.constant 0 : index
    %50 = vector.load %arg1[%c1_59, %c5_60, %c0_61] : memref<2x26x26xbf16, #tpu.memory_space<vmem>>, vector<1x16x26xbf16>
    %51 = vector.shape_cast %50 : vector<1x16x26xbf16> to vector<16x26xbf16>
    %c16_62 = arith.constant 16 : index
    %c130_63 = arith.constant 130 : index
    %52 = vector.load %arg5[%c16_62, %c130_63] : memref<32x384xbf16, #tpu.memory_space<vmem>>, vector<16x26xbf16>
    tpu.vector_store %arg5[%c16_62, %c130_63], %51 {strides = array<i32>} : memref<32x384xbf16, #tpu.memory_space<vmem>>, vector<16x26xbf16>,
    %c1_64 = arith.constant 1 : index
    %c6_65 = arith.constant 6 : index
    %c0_66 = arith.constant 0 : index
    %53 = vector.load %arg1[%c1_64, %c6_65, %c0_66] : memref<2x26x26xbf16, #tpu.memory_space<vmem>>, vector<1x16x26xbf16>
    %54 = vector.shape_cast %53 : vector<1x16x26xbf16> to vector<16x26xbf16>
    %c16_67 = arith.constant 16 : index
    %c156_68 = arith.constant 156 : index
    %55 = vector.load %arg5[%c16_67, %c156_68] : memref<32x384xbf16, #tpu.memory_space<vmem>>, vector<16x26xbf16>
    tpu.vector_store %arg5[%c16_67, %c156_68], %54 {strides = array<i32>} : memref<32x384xbf16, #tpu.memory_space<vmem>>, vector<16x26xbf16>,
    %c1_69 = arith.constant 1 : index
    %c7_70 = arith.constant 7 : index
    %c0_71 = arith.constant 0 : index
    %56 = vector.load %arg1[%c1_69, %c7_70, %c0_71] : memref<2x26x26xbf16, #tpu.memory_space<vmem>>, vector<1x16x26xbf16>
    %57 = vector.shape_cast %56 : vector<1x16x26xbf16> to vector<16x26xbf16>
    %c16_72 = arith.constant 16 : index
    %c182_73 = arith.constant 182 : index
    %58 = vector.load %arg5[%c16_72, %c182_73] : memref<32x384xbf16, #tpu.memory_space<vmem>>, vector<16x26xbf16>
    tpu.vector_store %arg5[%c16_72, %c182_73], %57 {strides = array<i32>} : memref<32x384xbf16, #tpu.memory_space<vmem>>, vector<16x26xbf16>,
    %c1_74 = arith.constant 1 : index
    %c8_75 = arith.constant 8 : index
    %c0_76 = arith.constant 0 : index
    %59 = vector.load %arg1[%c1_74, %c8_75, %c0_76] : memref<2x26x26xbf16, #tpu.memory_space<vmem>>, vector<1x16x26xbf16>
    %60 = vector.shape_cast %59 : vector<1x16x26xbf16> to vector<16x26xbf16>
    %c16_77 = arith.constant 16 : index
    %c208_78 = arith.constant 208 : index
    %61 = vector.load %arg5[%c16_77, %c208_78] : memref<32x384xbf16, #tpu.memory_space<vmem>>, vector<16x26xbf16>
    tpu.vector_store %arg5[%c16_77, %c208_78], %60 {strides = array<i32>} : memref<32x384xbf16, #tpu.memory_space<vmem>>, vector<16x26xbf16>,
    %c1_79 = arith.constant 1 : index
    %c9_80 = arith.constant 9 : index
    %c0_81 = arith.constant 0 : index
    %62 = vector.load %arg1[%c1_79, %c9_80, %c0_81] : memref<2x26x26xbf16, #tpu.memory_space<vmem>>, vector<1x16x26xbf16>
    %63 = vector.shape_cast %62 : vector<1x16x26xbf16> to vector<16x26xbf16>
    %c16_82 = arith.constant 16 : index
    %c234_83 = arith.constant 234 : index
    %64 = vector.load %arg5[%c16_82, %c234_83] : memref<32x384xbf16, #tpu.memory_space<vmem>>, vector<16x26xbf16>
    tpu.vector_store %arg5[%c16_82, %c234_83], %63 {strides = array<i32>} : memref<32x384xbf16, #tpu.memory_space<vmem>>, vector<16x26xbf16>,
    %c1_84 = arith.constant 1 : index
    %c10_85 = arith.constant 10 : index
    %c0_86 = arith.constant 0 : index
    %65 = vector.load %arg1[%c1_84, %c10_85, %c0_86] : memref<2x26x26xbf16, #tpu.memory_space<vmem>>, vector<1x16x26xbf16>
    %66 = vector.shape_cast %65 : vector<1x16x26xbf16> to vector<16x26xbf16>
    %c16_87 = arith.constant 16 : index
    %c260_88 = arith.constant 260 : index
    %67 = vector.load %arg5[%c16_87, %c260_88] : memref<32x384xbf16, #tpu.memory_space<vmem>>, vector<16x26xbf16>
    tpu.vector_store %arg5[%c16_87, %c260_88], %66 {strides = array<i32>} : memref<32x384xbf16, #tpu.memory_space<vmem>>, vector<16x26xbf16>,
    %c0_89 = arith.constant 0 : index
    %c0_90 = arith.constant 0 : index
    %68 = vector.load %arg5[%c0_89, %c0_90] : memref<32x384xbf16, #tpu.memory_space<vmem>>, vector<32x384xbf16>
    %c0_91 = arith.constant 0 : index
    %c0_92 = arith.constant 0 : index
    %69 = vector.load %arg2[%c0_91, %c0_92] : memref<384x256xbf16, #tpu.memory_space<vmem>>, vector<384x256xbf16>
    %cst_93 = arith.constant dense<0.000000e+00> : vector<32x256xf32>
    %70 = tpu.matmul %68, %69, %cst_93 {dimension_numbers = #tpu.dot_dimension_numbers<[1], [0], [0], [1], [0, 0, 1, 1], [], []>} : vector<32x384xbf16>, vector<384x256xbf16>, vector<32x256xf32> -> vector<32x256xf32>
    %c0_94 = arith.constant 0 : index
    %c0_95 = arith.constant 0 : index
    %71 = vector.load %arg3[%c0_94, %c0_95] : memref<1x256xf32, #tpu.memory_space<vmem>>, vector<1x256xf32>
    %72 = vector.broadcast %71 : vector<1x256xf32> to vector<32x256xf32>
    %73 = arith.addf %70, %72 : vector<32x256xf32>
    %74 = vector.extract_strided_slice %73 {offsets = [0, 0], sizes = [16, 256], strides = [1, 1]} : vector<32x256xf32> to vector<16x256xf32>
    %c0_96 = arith.constant 0 : index
    %c0_97 = arith.constant 0 : index
    %c0_98 = arith.constant 0 : index
    %75 = vector.load %arg4[%c0_96, %c0_97, %c0_98] : memref<2x16x256xf32, #tpu.memory_space<vmem>>, vector<1x16x256xf32>
    %76 = vector.shape_cast %75 : vector<1x16x256xf32> to vector<16x256xf32>
    %77 = vector.shape_cast %74 : vector<16x256xf32> to vector<1x16x256xf32>
    tpu.vector_store %arg4[%c0_96, %c0_97, %c0_98], %77 {strides = array<i32>} : memref<2x16x256xf32, #tpu.memory_space<vmem>>, vector<1x16x256xf32>,
    %78 = vector.extract_strided_slice %73 {offsets = [16, 0], sizes = [16, 256], strides = [1, 1]} : vector<32x256xf32> to vector<16x256xf32>
    %c1_99 = arith.constant 1 : index
    %c0_100 = arith.constant 0 : index
    %c0_101 = arith.constant 0 : index
    %79 = vector.load %arg4[%c1_99, %c0_100, %c0_101] : memref<2x16x256xf32, #tpu.memory_space<vmem>>, vector<1x16x256xf32>
    %80 = vector.shape_cast %79 : vector<1x16x256xf32> to vector<16x256xf32>
    %81 = vector.shape_cast %78 : vector<16x256xf32> to vector<1x16x256xf32>
    tpu.vector_store %arg4[%c1_99, %c0_100, %c0_101], %81 {strides = array<i32>} : memref<2x16x256xf32, #tpu.memory_space<vmem>>, vector<1x16x256xf32>,
    return
  }
  func.func @transform_0(%arg0: i32) -> (i32, i32, i32) {
    %c0_i32 = arith.constant 0 : i32
    %c0_i32_0 = arith.constant 0 : i32
    %c0_i32_1 = arith.constant 0 : i32
    return %arg0, %c0_i32, %c0_i32_0 : i32, i32, i32
  }
  func.func @transform_1(%arg0: i32) -> (i32, i32) {
    %c0_i32 = arith.constant 0 : i32
    %c0_i32_0 = arith.constant 0 : i32
    %c0_i32_1 = arith.constant 0 : i32
    return %c0_i32, %c0_i32_0 : i32, i32
  }
  func.func @transform_2(%arg0: i32) -> (i32, i32) {
    %c0_i32 = arith.constant 0 : i32
    %c0_i32_0 = arith.constant 0 : i32
    %c0_i32_1 = arith.constant 0 : i32
    return %c0_i32, %c0_i32_0 : i32, i32
  }
  func.func @transform_3(%arg0: i32) -> (i32, i32, i32) {
    %c0_i32 = arith.constant 0 : i32
    %c0_i32_0 = arith.constant 0 : i32
    %c0_i32_1 = arith.constant 0 : i32
    return %arg0, %c0_i32, %c0_i32_0 : i32, i32, i32
  }
}

</mosaic_0001>

<bundles_post_ra>
// kernel: segmentation_model_forward.1
= control target key start
LH: loop header
LB: loop body
LE: loop exit
PB: predicated region body
PF: predicated region fallthrough
CT: control target
= control target key end

     0   :  { %vm178_vm0 = vcmask 1044480   ;;  %vm122_vm1 = vcmask 1045504   ;;  %vm144_vm2 = vsmask.f32 5376  ;;  %s1214_s22 = smov 28   ;;  %s1215_s27 = smov 104   ;;  %s1604_s0 = inlined_call_operand.vmem [shape: bf16[2,26,26], index: 0, kind: input, shape index: {}]   ;;  %s1605_s1 = inlined_call_operand.vmem [shape: bf16[384,256], index: 1, kind: input, shape index: {}]   ;;  %s1606_s2 = inlined_call_operand.vmem [shape: f32[1,256], index: 2, kind: input, shape index: {}]   ;;  %s1607_s3 = inlined_call_operand.vmem [shape: f32[2,16,256], index: 3, kind: output, shape index: {}]  }
   0x1   :  { %v1102_v0 = vld [vmem:[%s1604_s0] sm:$0xf8]   ;;  %v1103_v1 = vld [vmem:[%s1604_s0 + $0x8] ss:$0 sps:$4 sm:$0x77]   ;;  %vm68_vm3 = vcmask 1046528  }
   0x2   :  { %v179_v2 = vrot.slane %v1102_v0, 3  ;;  %v180_v3 = vrot.slane %v1103_v1, 3  ;;  %v1104_v4 = vld [vmem:[%s1604_s0] sm:$0xfc]   ;;  %v1111_v28 = vld [vmem:[%s1604_s0 + $0x8] ss:$0 sps:$4 sm:$0xff]  }
   0x3   :  { %v1105_v5 = vld [vmem:[%s1604_s0 + $0x8] ss:$0 sps:$4 sm:$0x33]   ;;  %v123_v7 = vrot.slane %v1104_v4, 2  ;;  %v1106_v8 = vld [vmem:[%s1604_s0] sm:$0xfc]  }
   0x4   :  { %v181_v6 = vsel %vm178_vm0, %v179_v2, %v180_v3  ;;  %v124_v9 = vrot.slane %v1105_v5, 2  ;;  %v1107_v10 = vld [vmem:[%s1604_s0 + $0x8] ss:$0 sps:$4 sm:$0x77]   ;;  %v146_v11 = vshrl.u32 %v1106_v8, 16  ;;  %v149_v12 = vshll.u32 %v1106_v8, 16 }
   0x5   :  { %182 = vrot.lane.b32.xlu1 %v181_v6, %s1214_s22  ;;  %v154_v14 = vshrl.u32 %v1107_v10, 16  ;;  %v157_v15 = vshll.u32 %v1107_v10, 16  ;;  %v1108_v16 = vld [vmem:[%s1604_s0] sm:$0xfe]   ;;  %vm198_vm4 = vsmask.f32 4352 }
   0x6   :  { %v125_v13 = vsel %vm122_vm1, %v123_v7, %v124_v9  ;;  %v148_v17 = vrot.slane %v146_v11, 2  ;;  %v151_v18 = vrot.slane %v149_v12, 3  ;;  %v1109_v19 = vld [vmem:[%s1604_s0 + $0x8] ss:$0 sps:$4 sm:$0x11]   ;;  %v69_v22 = vrot.slane %v1108_v16, 1 }
   0x7   :  { %126 = vrot.lane.b32.xlu0 %v125_v13, %s1215_s27  ;;  %v156_v20 = vrot.slane %v154_v14, 2  ;;  %v159_v21 = vrot.slane %v157_v15, 3  ;;  %v70_v24 = vrot.slane %v1109_v19, 1  ;;  %v1110_v25 = vld [vmem:[%s1604_s0] sm:$0xf8]   ;;  %s1216_s9 = smov 52  }
   0x8   :  { %v152_v23 = vor.u32 %v151_v18, %v148_v17  ;;  %v1112_v26 = vld [vmem:[%s1604_s0] sm:$0xff]   ;;  %v200_v30 = vshrl.u32 %v1110_v25, 16  ;;  %v203_v31 = vshll.u32 %v1110_v25, 16  ;;  %v208_v33 = vshrl.u32 %v1111_v28, 16  ;;  %s1217_s12 = smov 2   ;;  %s1218_s21 = smov 54  }
   0x9   :  { %v160_v27 = vor.u32 %v159_v21, %v156_v20  ;;  %v71_v29 = vsel %vm68_vm3, %v69_v22, %v70_v24  ;;  %v211_v34 = vshll.u32 %v1111_v28, 16  ;;  %v1113_v35 = vld [vmem:[%s1604_s0 + $0x8] ss:$0 sps:$4 sm:$0x11]   ;;  %v41_v36 = vshrl.u32 %v1112_v26, 16  ;;  %s1219_s23 = smov 26  }
   0xa   :  { %72 = vrot.lane.b32.xlu1 %v71_v29, %s1216_s9  ;;  %v202_v37 = vrot.slane %v200_v30, 3  ;;  %v205_v38 = vrot.slane %v203_v31, 4  ;;  %vm39_vm5 = vsmask.f32 7424  ;;  %v43_v39 = vshll.u32 %v1112_v26, 16  ;;  %v1117_v47 = vld [vmem:[%s1604_s0 + $0x4] sm:$0xff]  }
   0xb   :  { %v161_v32 = vsel %vm144_vm2, %v152_v23, %v160_v27  ;;  %v210_v40 = vrot.slane %v208_v33, 3  ;;  %v213_v41 = vrot.slane %v211_v34, 4  ;;  %v48_v42 = vshll.u32 %v1113_v35, 16  ;;  %v1114_v49 = vld [vmem:[%s1604_s0 + $0x4] sm:$0xff]   ;;  %v1127_v3 = vld [vmem:[%s1604_s0 + $0x10] sm:$0xff]   ;;  %s1220_s29 = smov 80  }
   0xc   :  { %162 = vrot.lane.b32.xlu0 %v161_v32, %s1217_s12  ;;  %v206_v43 = vor.u32 %v205_v38, %v202_v37  ;;  %v45_v44 = vrot.slane %v43_v39, 1  ;;  %v1115_v50 = vld [vmem:[%s1604_s0] sm:$0xfe]   ;;  %v1116_v51 = vld [vmem:[%s1604_s0 + $0x8] ss:$0 sps:$4 sm:$0x33]  }
   0xd   :  { %v214_v45 = vor.u32 %v213_v41, %v210_v40  ;;  %v50_v46 = vrot.slane %v48_v42, 1  ;;  %vm88_vm6 = vsmask.f32 6400  ;;  %v90_v54 = vshrl.u32 %v1115_v50, 16  ;;  %v1119_v5 = vld [vmem:[%s1604_s0 + $0x4] sm:$0xfe]  }
   0xe   :  { %v46_v48 = vor.u32 %v45_v44, %v41_v36  ;;  %v93_v55 = vshll.u32 %v1115_v50, 16  ;;  %v98_v56 = vshrl.u32 %v1116_v51, 16  ;;  %v101_v57 = vshll.u32 %v1116_v51, 16  ;;  %v1118_v58 = vld [vmem:[%s1604_s0 + $0xc] ss:$0 sps:$4 sm:$0x11]  }
   0xf   :  { %v215_v52 = vsel %vm198_vm4, %v206_v43, %v214_v45  ;;  %v245_v59 = vshrl.u32 %v1117_v47, 16  ;;  %v247_v60 = vshll.u32 %v1117_v47, 16  ;;  %v92_v61 = vrot.slane %v90_v54, 1  ;;  %v1120_v9 = vld [vmem:[%s1604_s0 + $0xc] ss:$0 sps:$4 sm:$0x11]  }
  0x10   :  { %216 = vrot.lane.b32.xlu0 %v215_v52, %s1218_s21  ;;  %v51_v53 = vsel %vm39_vm5, %v46_v48, %v50_v46  ;;  %v95_v62 = vrot.slane %v93_v55, 2  ;;  %v100_v63 = vrot.slane %v98_v56, 1  ;;  %v103_v0 = vrot.slane %v101_v57, 2  ;;  %v1121_v11 = vld [vmem:[%s1604_s0 + $0x10] sm:$0xfc]   ;;  %s1221_s13 = smov 78  }
  0x11   :  { %52 = vrot.lane.b32.xlu1 %v51_v53, %s1219_s23  ;;  %v249_v1 = vrot.slane %v247_v60, 1  ;;  %v252_v2 = vshll.u32 %v1118_v58, 16  ;;  %v274_v10 = vrot.slane %v1119_v5, 1  ;;  %v304_v12 = vshrl.u32 %v1127_v3, 16  ;;  %s1222_s14 = smov 106   ;;  %v1136_v28 = vld [vmem:[%s1604_s0 + $0x14] sm:$0xff]  }
  0x12   :  { %v96_v4 = vor.u32 %v95_v62, %v92_v61  ;;  %v104_v6 = vor.u32 %v103_v0, %v100_v63  ;;  %v275_v15 = vrot.slane %v1120_v9, 1  ;;  %v1122_v16 = vld [vmem:[%s1604_s0 + $0x18] ss:$0 sps:$4 sm:$0x33]   ;;  %v380_v17 = vrot.slane %v1121_v11, 2  ;;  %s1223_s26 = smov 4  }
  0x13   :  { %v250_v7 = vor.u32 %v249_v1, %v245_v59  ;;  %v254_v8 = vrot.slane %v252_v2, 1  ;;  %v306_v18 = vshll.u32 %v1127_v3, 16  ;;  %v381_v20 = vrot.slane %v1122_v16, 2  ;;  %v1123_v21 = vld [vmem:[%s1604_s0 + $0x10] sm:$0xfc]  }
  0x14   :  { %228 = vrot.lane.b32.xlu0 %v1114_v49, %s1220_s29  ;;  %v105_v13 = vsel %vm88_vm6, %v96_v4, %v104_v6  ;;  %v276_v19 = vsel %vm68_vm3, %v274_v10, %v275_v15  ;;  %v1124_v22 = vld [vmem:[%s1604_s0 + $0x18] ss:$0 sps:$4 sm:$0x77]   ;;  %v400_v24 = vshrl.u32 %v1123_v21, 16  ;;  %v403_v25 = vshll.u32 %v1123_v21, 16 }
  0x15   :  { %v255_v14 = vsel %vm39_vm5, %v250_v7, %v254_v8  ;;  %106 = vrot.lane.b32.xlu1 %v105_v13, %s1221_s13  ;;  %v382_v23 = vsel %vm122_vm1, %v380_v17, %v381_v20  ;;  %v408_v26 = vshrl.u32 %v1124_v22, 16  ;;  %v1125_v27 = vld [vmem:[%s1604_s0 + $0x10] sm:$0xf8]   ;;  %v411_v29 = vshll.u32 %v1124_v22, 16  ;;  %v1130_v47 = vld [vmem:[%s1604_s0 + $0x18] ss:$0 sps:$4 sm:$0xff]  }
  0x16   :  { %v1126_v30 = vld [vmem:[%s1604_s0 + $0x18] ss:$0 sps:$4 sm:$0x77]   ;;  %v402_v31 = vrot.slane %v400_v24, 2  ;;  %v405_v32 = vrot.slane %v403_v25, 3  ;;  %v431_v34 = vrot.slane %v1125_v27, 3 }
  0x17   :  { %v410_v33 = vrot.slane %v408_v26, 2  ;;  %v413_v35 = vrot.slane %v411_v29, 3  ;;  %v432_v36 = vrot.slane %v1126_v30, 3  ;;  %v308_v37 = vrot.slane %v306_v18, 1  ;;  %v1129_v44 = vld [vmem:[%s1604_s0 + $0x10] sm:$0xf8]  }
  0x18   :  { %256 = vrot.lane.b32.xlu0 %v255_v14, %s1222_s14  ;;  %v493_v38 = vshrl.u32 %v1136_v28, 16  ;;  %v406_v39 = vor.u32 %v405_v32, %v402_v31  ;;  %v1128_v40 = vld [vmem:[%s1604_s0 + $0x18] ss:$0 sps:$4 sm:$0x11]   ;;  %v495_v41 = vshll.u32 %v1136_v28, 16  ;;  %v450_v50 = vshrl.u32 %v1129_v44, 16 }
  0x19   :  { %277 = vrot.lane.b32.xlu1 %v276_v19, %s1223_s26  ;;  %v414_v42 = vor.u32 %v413_v35, %v410_v33  ;;  %v433_v43 = vsel %vm178_vm0, %v431_v34, %v432_v36  ;;  %v309_v45 = vor.u32 %v308_v37, %v304_v12  ;;  %v311_v46 = vshll.u32 %v1128_v40, 16  ;;  %v1131_v55 = vld [vmem:[%s1604_s0 + $0x10] sm:$0xfe]   ;;  %v1132_v58 = vld [vmem:[%s1604_s0 + $0x18] ss:$0 sps:$4 sm:$0x11]  }
  0x1a   :  { %v497_v48 = vrot.slane %v495_v41, 1  ;;  %v453_v51 = vshll.u32 %v1129_v44, 16  ;;  %v458_v53 = vshrl.u32 %v1130_v47, 16  ;;  %v461_v54 = vshll.u32 %v1130_v47, 16  ;;  %v1134_v2 = vld [vmem:[%s1604_s0 + $0x10] sm:$0xfe]  }
  0x1b   :  { %v415_v49 = vsel %vm144_vm2, %v406_v39, %v414_v42  ;;  %v313_v52 = vrot.slane %v311_v46, 1  ;;  %v452_v56 = vrot.slane %v450_v50, 3  ;;  %v330_v62 = vrot.slane %v1131_v55, 1  ;;  %v1133_v4 = vld [vmem:[%s1604_s0 + $0x14] sm:$0xff]   ;;  %v1142_v24 = vld [vmem:[%s1605_s1] ss:$8 sps:$4 sm:$0xff]  }
  0x1c   :  { %383 = vrot.lane.b32.xlu0 %v382_v23, %s1215_s27  ;;  %v455_v57 = vrot.slane %v453_v51, 4  ;;  %v460_v60 = vrot.slane %v458_v53, 3  ;;  %v463_v61 = vrot.slane %v461_v54, 4  ;;  %v331_v0 = vrot.slane %v1132_v58, 1  ;;  %v1138_v19 = vld [vmem:[%s1604_s0 + $0x14] sm:$0xfe]  }
  0x1d   :  { %416 = vrot.lane.b32.xlu1 %v415_v49, %s1217_s12  ;;  %v314_v59 = vsel %vm39_vm5, %v309_v45, %v313_v52  ;;  %v1135_v5 = vld [vmem:[%s1604_s0 + $0x18] ss:$0 sps:$4 sm:$0x33]   ;;  %v349_v7 = vshrl.u32 %v1134_v2, 16  ;;  %v352_v8 = vshll.u32 %v1134_v2, 16  ;;  %v498_v16 = vor.u32 %v497_v48, %v493_v38  ;;  %v1188_v48 = vld [vmem:[%s1604_s0] sm:$0xff]  }
  0x1e   :  { %v456_v63 = vor.u32 %v455_v57, %v452_v56  ;;  %v464_v1 = vor.u32 %v463_v61, %v460_v60  ;;  %v332_v3 = vsel %vm68_vm3, %v330_v62, %v331_v0  ;;  %v357_v9 = vshrl.u32 %v1135_v5, 16  ;;  %v1137_v11 = vld [vmem:[%s1604_s0 + $0x1c] ss:$0 sps:$4 sm:$0x11]   ;;  %v1140_v23 = vld [vmem:[%s1605_s1 + $0x4] ss:$8 sps:$4 sm:$0xff]  }
  0x1f   :  { %v360_v10 = vshll.u32 %v1135_v5, 16  ;;  %v351_v12 = vrot.slane %v349_v7, 1  ;;  %v354_v13 = vrot.slane %v352_v8, 2  ;;  %v500_v17 = vshll.u32 %v1137_v11, 16  ;;  %v1143_v27 = vld [vmem:[%s1605_s1 + $0x14] ss:$8 sps:$4 sm:$0xff]   ;;  %833 = vmatprep.subr.bf16.mxu1 %v1140_v23 }
  0x20   :  { %434 = vrot.lane.b32.xlu0 %v433_v43, %s1214_s22  ;;  %v465_v6 = vsel %vm198_vm4, %v456_v63, %v464_v1  ;;  %v359_v14 = vrot.slane %v357_v9, 1  ;;  %v1139_v20 = vld [vmem:[%s1604_s0 + $0x1c] ss:$0 sps:$4 sm:$0x11]   ;;  %v520_v25 = vrot.slane %v1138_v19, 1  ;;  %834 = vmatpush1.bf16.msra.mxu1 %v1142_v24  ;;  %vm15_vm7 = vcmask 1047792  }
  0x21   :  { %315 = vrot.lane.b32.xlu1 %v314_v59, %s1219_s23  ;;  %v362_v15 = vrot.slane %v360_v10, 2  ;;  %v355_v18 = vor.u32 %v354_v13, %v351_v12  ;;  %v502_v22 = vrot.slane %v500_v17, 1  ;;  %v521_v26 = vrot.slane %v1139_v20, 1  ;;  %v1145_v30 = vld [vmem:[%s1605_s1 + $0x10] ss:$8 sps:$4 sm:$0xff]   ;;  %835 = vmatprep.subr.bf16.mxu1 %v1143_v27 }
  0x22   :  { %v1146_v32 = vld [vmem:[%s1605_s1 + $0x24] ss:$8 sps:$4 sm:$0xff]   ;;  %v1148_v33 = vld [vmem:[%s1605_s1 + $0x20] ss:$8 sps:$4 sm:$0xff]   ;;  %v1149_v34 = vld [vmem:[%s1605_s1 + $0x34] ss:$8 sps:$4 sm:$0xff]  }
  0x23   :  { %v363_v21 = vor.u32 %v362_v15, %v359_v14  ;;  %v503_v29 = vsel %vm39_vm5, %v498_v16, %v502_v22  ;;  %v522_v31 = vsel %vm68_vm3, %v520_v25, %v521_v26  ;;  %v1151_v35 = vld [vmem:[%s1605_s1 + $0x30] ss:$8 sps:$4 sm:$0xff]   ;;  %v1166_v36 = vld [vmem:[%s1605_s1 + $0x104] ss:$8 sps:$4 sm:$0xff]   ;;  %v1169_v37 = vld [vmem:[%s1605_s1 + $0x100] ss:$8 sps:$4 sm:$0xff]  }
  0x24   :  { %466 = vrot.lane.b32.xlu0 %v465_v6, %s1218_s21  ;;  %836 = vmatpush1.bf16.msra.mxu1 %v1145_v30  ;;  %v1152_v38 = vld [vmem:[%s1605_s1 + $0x44] ss:$8 sps:$4 sm:$0xff]   ;;  %v1172_v39 = vld [vmem:[%s1605_s1 + $0x114] ss:$8 sps:$4 sm:$0xff]   ;;  %v1224_v40 = vmov 0   ;;  %vm26_vm8 = vcmask 211968  }
  0x25   :  { %333 = vrot.lane.b32.xlu1 %v332_v3, %s1216_s9  ;;  %v364_v28 = vsel %vm88_vm6, %v355_v18, %v363_v21  ;;  %837 = vmatprep.subr.bf16.mxu1 %v1146_v32  ;;  %16 = vst.msk [vmem:[#allocation2 + $0x10] sm:$0xff] %vm15_vm7, %v1224_v40  ;;  %17 = vst.msk [vmem:[#allocation2 + $0x28] sm:$0xff] %vm15_vm7, %v1224_v40  ;;  %v1175_v41 = vld [vmem:[%s1605_s1 + $0x110] ss:$8 sps:$4 sm:$0xff]   ;;  %v1154_v42 = vld [vmem:[%s1605_s1 + $0x40] ss:$8 sps:$4 sm:$0xff]  }
  0x26   :  { %886 = vmatprep.subr.bf16.mxu0 %v1166_v36  ;;  %918 = vmatprep.mubr.bf16.mxu0 %v1224_v40  ;;  %v1178_v43 = vld [vmem:[%s1605_s1 + $0x124] ss:$8 sps:$4 sm:$0xff]   ;;  %v1155_v44 = vld [vmem:[%s1605_s1 + $0x54] ss:$8 sps:$4 sm:$0xff]   ;;  %v1181_v45 = vld [vmem:[%s1605_s1 + $0x120] ss:$8 sps:$4 sm:$0xff]  }
  0x27   :  { %887 = vmatpush1.bf16.msra.mxu0 %v1169_v37  ;;  %v1157_v46 = vld [vmem:[%s1605_s1 + $0x50] ss:$8 sps:$4 sm:$0xff]   ;;  %v1184_v47 = vld [vmem:[%s1605_s1 + $0x134] ss:$8 sps:$4 sm:$0xff]   ;;  %v1158_v49 = vld [vmem:[%s1605_s1 + $0x64] ss:$8 sps:$4 sm:$0xff]  }
  0x28   :  { %477 = vrot.lane.b32.xlu0 %v1133_v4, %s1220_s29  ;;  %838 = vmatpush1.bf16.msra.mxu1 %v1148_v33  ;;  %v1187_v50 = vld [vmem:[%s1605_s1 + $0x130] ss:$8 sps:$4 sm:$0xff]   ;;  %27 = vst.msk [vmem:[#allocation2] sm:$0xff] %vm26_vm8, %v1188_v48  ;;  %v1191_v51 = vld [vmem:[%s1605_s1 + $0x144] ss:$8 sps:$4 sm:$0xff]   ;;  %vm131_vm9 = vcmask 15360  }
  0x29   :  { %365 = vrot.lane.b32.xlu1 %v364_v28, %s1221_s13  ;;  %839 = vmatprep.subr.bf16.mxu1 %v1149_v34  ;;  %v1160_v52 = vld [vmem:[%s1605_s1 + $0x60] ss:$8 sps:$4 sm:$0xff]   ;;  %v1161_v53 = vld [vmem:[%s1605_s1 + $0x74] ss:$8 sps:$4 sm:$0xff]   ;;  %v1163_v56 = vld [vmem:[%s1605_s1 + $0x70] ss:$8 sps:$4 sm:$0xff]  }
  0x2a   :  { %888 = vmatprep.subr.bf16.mxu0 %v1172_v39  ;;  %v1194_v54 = vld [vmem:[%s1605_s1 + $0x140] ss:$8 sps:$4 sm:$0xff]   ;;  %v1197_v55 = vld [vmem:[%s1605_s1 + $0x154] ss:$8 sps:$4 sm:$0xff]   ;;  %v1164_v57 = vld [vmem:[%s1605_s1 + $0x84] ss:$8 sps:$4 sm:$0xff]  }
  0x2b   :  { %889 = vmatpush1.bf16.msra.mxu0 %v1175_v41  ;;  %v1200_v58 = vld [vmem:[%s1605_s1 + $0x150] ss:$8 sps:$4 sm:$0xff]   ;;  %v1203_v59 = vld [vmem:[%s1605_s1 + $0x164] ss:$8 sps:$4 sm:$0xff]   ;;  %v1168_v60 = vld [vmem:[%s1605_s1 + $0x80] ss:$8 sps:$4 sm:$0xff]   ;;  %v583_v41 = vlaneseq }
  0x2c   :  { %504 = vrot.lane.b32.xlu0 %v503_v29, %s1222_s14  ;;  %840 = vmatpush1.bf16.msra.mxu1 %v1151_v35  ;;  %v1213_v61 = vld [vmem:[%s1604_s0 + $0x10] sm:$0xff]   ;;  %v1206_v63 = vld [vmem:[%s1605_s1 + $0x160] ss:$8 sps:$4 sm:$0xff]   ;;  %v1176_v2 = vld [vmem:[%s1605_s1 + $0xa4] ss:$8 sps:$4 sm:$0xff]   ;;  %vm165_vm10 = vcmask 228368  }
  0x2d   :  { %523 = vrot.lane.b32.xlu1 %v522_v31, %s1223_s26  ;;  %841 = vmatprep.subr.bf16.mxu1 %v1152_v38  ;;  %v1170_v62 = vld [vmem:[%s1605_s1 + $0x94] ss:$8 sps:$4 sm:$0xff]   ;;  %291 = vst.msk [vmem:[#allocation2 + $0x18] sm:$0xff] %vm26_vm8, %v1213_v61  ;;  %v1174_v1 = vld [vmem:[%s1605_s1 + $0x90] ss:$8 sps:$4 sm:$0xff]   ;;  %vm185_vm11 = vcmask 441568  }
  0x2e   :  { %890 = vmatprep.subr.bf16.mxu0 %v1178_v43  ;;  %v1209_v0 = vld [vmem:[%s1605_s1 + $0x174] ss:$8 sps:$4 sm:$0xff]   ;;  %v1212_v3 = vld [vmem:[%s1605_s1 + $0x170] ss:$8 sps:$4 sm:$0xff]   ;;  %v1180_v4 = vld [vmem:[%s1605_s1 + $0xa0] ss:$8 sps:$4 sm:$0xff]  }
  0x2f   :  { %891 = vmatpush1.bf16.msra.mxu0 %v1181_v45  ;;  %v1182_v5 = vld [vmem:[%s1605_s1 + $0xb4] ss:$8 sps:$4 sm:$0xff]   ;;  %v1186_v6 = vld [vmem:[%s1605_s1 + $0xb0] ss:$8 sps:$4 sm:$0xff]   ;;  %v1189_v7 = vld [vmem:[%s1605_s1 + $0xc4] ss:$8 sps:$4 sm:$0xff]  }
  0x30   :  { %842 = vmatpush1.bf16.msra.mxu1 %v1154_v42  ;;  %892 = vmatprep.subr.bf16.mxu0 %v1184_v47  ;;  %v1193_v8 = vld [vmem:[%s1605_s1 + $0xc0] ss:$8 sps:$4 sm:$0xff]   ;;  %v1195_v9 = vld [vmem:[%s1605_s1 + $0xd4] ss:$8 sps:$4 sm:$0xff]   ;;  %v1199_v10 = vld [vmem:[%s1605_s1 + $0xd0] ss:$8 sps:$4 sm:$0xff]  }
  0x31   :  { %843 = vmatprep.subr.bf16.mxu1 %v1155_v44  ;;  %v1201_v11 = vld [vmem:[%s1605_s1 + $0xe4] ss:$8 sps:$4 sm:$0xff]   ;;  %v1205_v12 = vld [vmem:[%s1605_s1 + $0xe0] ss:$8 sps:$4 sm:$0xff]   ;;  %v1207_v13 = vld [vmem:[%s1605_s1 + $0xf4] ss:$8 sps:$4 sm:$0xff]  }
  0x32   :  { %v1211_v14 = vld [vmem:[%s1605_s1 + $0xf0] ss:$8 sps:$4 sm:$0xff]   ;;  %vm219_vm12 = vcmask 654768   ;;  %vm55_vm13 = vcmask 425168   ;;  %vm75_vm14 = vcmask 638368   ;;  %vm231_vm15 = vcmask 867968  }
  0x33   :  { %893 = vmatpush1.bf16.msra.mxu0 %v1187_v50  ;;  %vm109_vm0 = vcmask 851568   ;;  %vm259_vm1 = vcmask 1048400   ;;  %vm261_vm2 = vcmask 31744   ;;  %vm129_vm3 = vcmask 1048384   ;;  %v581_v44 = vld [vmem:[%s1606_s2] sm:$0x3] }
  0x34   :  { %844 = vmatpush1.bf16.msra.mxu1 %v1157_v46  ;;  %894 = vmatprep.subr.bf16.mxu0 %v1191_v51  ;;  %vm280_vm4 = vcmask 244768   ;;  %v584_v42 = vshrl.u32 %v583_v41, 7 }
  0x35   :  { %845 = vmatprep.subr.bf16.mxu1 %v1158_v49 }
  0x36   :  { %v585_v43 = vsub.s32 0, %v584_v42  ;;  %v589_v45 = vsub.s32 1, %v584_v42 }
  0x37   :  { %895 = vmatpush1.bf16.msra.mxu0 %v1194_v54 }
  0x38   :  { %846 = vmatpush1.bf16.msra.mxu1 %v1160_v52  ;;  %896 = vmatprep.subr.bf16.mxu0 %v1197_v55  ;;  %v586_v46 = vrot.slane %v581_v44, %v585_v43  ;;  %v590_v47 = vrot.slane %v581_v44, %v589_v45 }
  0x39   :  { %847 = vmatprep.subr.bf16.mxu1 %v1161_v53 }
  0x3b   :  { %897 = vmatpush1.bf16.msra.mxu0 %v1200_v58 }
  0x3c   :  { %848 = vmatpush1.bf16.msra.mxu1 %v1163_v56  ;;  %898 = vmatprep.subr.bf16.mxu0 %v1203_v59 }
  0x3d   :  { %849 = vmatprep.subr.bf16.mxu1 %v1164_v57 }
  0x3f   :  { %899 = vmatpush1.bf16.msra.mxu0 %v1206_v63 }
  0x40   :  { %850 = vmatpush1.bf16.msra.mxu1 %v1168_v60  ;;  %900 = vmatprep.subr.bf16.mxu0 %v1209_v0 }
  0x41   :  { %851 = vmatprep.subr.bf16.mxu1 %v1170_v62 }
  0x43   :  { %901 = vmatpush1.bf16.msra.mxu0 %v1212_v3 }
  0x44   :  { %852 = vmatpush1.bf16.msra.mxu1 %v1174_v1 }
  0x45   :  { %853 = vmatprep.subr.bf16.mxu1 %v1176_v2 }
  0x48   :  { %854 = vmatpush1.bf16.msra.mxu1 %v1180_v4 }
  0x49   :  { %855 = vmatprep.subr.bf16.mxu1 %v1182_v5 }
  0x4c   :  { %856 = vmatpush1.bf16.msra.mxu1 %v1186_v6 }
  0x4d   :  { %857 = vmatprep.subr.bf16.mxu1 %v1189_v7 }
  0x50   :  { %858 = vmatpush1.bf16.msra.mxu1 %v1193_v8 }
  0x51   :  { %859 = vmatprep.subr.bf16.mxu1 %v1195_v9 }
  0x54   :  { %860 = vmatpush1.bf16.msra.mxu1 %v1199_v10 }
  0x55   :  { %861 = vmatprep.subr.bf16.mxu1 %v1201_v11 }
  0x58   :  { %862 = vmatpush1.bf16.msra.mxu1 %v1205_v12 }
  0x59   :  { %863 = vmatprep.subr.bf16.mxu1 %v1207_v13 }
  0x5c   :  { %864 = vmatpush1.bf16.msra.mxu1 %v1211_v14 }
  0x77   :  { %v183_v16 = vpop.permute.xlu1 %182 }
  0x79   :  { %v127_v15 = vpop.permute.xlu0 %126 }
  0x7a   :  { %132 = vst.msk [vmem:[#allocation2 + $0x8] sm:$0xff] %vm131_vm9, %v127_v15 }
  0x7c   :  { %v73_v18 = vpop.permute.xlu1 %72 }
  0x7e   :  { %v163_v17 = vpop.permute.xlu0 %162 }
  0x7f   :  { %166 = vst.msk [vmem:[#allocation2 + $0x8] sm:$0xff] %vm165_vm10, %v163_v17 }
  0x80   :  { %186 = vst.msk [vmem:[#allocation2 + $0x8] sm:$0xff] %vm185_vm11, %v183_v16 }
  0x82   :  { %v217_v19 = vpop.permute.xlu0 %216 }
  0x83   :  { %220 = vst.msk [vmem:[#allocation2 + $0x8] sm:$0xff] %vm219_vm12, %v217_v19  ;;  %v53_v20 = vpop.permute.xlu1 %52 }
  0x84   :  { %56 = vst.msk [vmem:[#allocation2] sm:$0xff] %vm55_vm13, %v53_v20 }
  0x85   :  { %76 = vst.msk [vmem:[#allocation2] sm:$0xff] %vm75_vm14, %v73_v18 }
  0x86   :  { %v229_v21 = vpop.permute.xlu0 %228 }
  0x87   :  { %232 = vst.msk [vmem:[#allocation2 + $0x8] sm:$0xff] %vm231_vm15, %v229_v21  ;;  %v107_v22 = vpop.permute.xlu1 %106 }
  0x88   :  { %110 = vst.msk [vmem:[#allocation2] sm:$0xff] %vm109_vm0, %v107_v22 }
  0x89   :  { %130 = vst.msk [vmem:[#allocation2] sm:$0xff] %vm129_vm3, %v127_v15 }
  0x8a   :  { %v257_v23 = vpop.permute.xlu0 %256 }
  0x8b   :  { %260 = vst.msk [vmem:[#allocation2 + $0x8] sm:$0xff] %vm259_vm1, %v257_v23  ;;  %v278_v24 = vpop.permute.xlu1 %277 }
  0x8c   :  { %262 = vst.msk [vmem:[#allocation2 + $0x10] sm:$0xff] %vm261_vm2, %v257_v23 }
  0x8d   :  { %281 = vst.msk [vmem:[#allocation2 + $0x10] sm:$0xff] %vm280_vm4, %v278_v24 }
  0x8e   :  { %v384_v25 = vpop.permute.xlu0 %383 }
  0x8f   :  { %387 = vst.msk [vmem:[#allocation2 + $0x20] sm:$0xff] %vm131_vm9, %v384_v25  ;;  %v417_v29 = vpop.permute.xlu1 %416 }
  0x90   :  { %v527_v27 = vld [vmem:[#allocation2] sm:$0xff]  ;;  %419 = vst.msk [vmem:[#allocation2 + $0x20] sm:$0xff] %vm165_vm10, %v417_v29 }
  0x92   :  { %v528_v26 = vld [vmem:[#allocation2 + $0x8] sm:$0xff]  ;;  %v435_v28 = vpop.permute.xlu0 %434 }
  0x93   :  { %865 = vmatprep.mubr.bf16.mxu1 %v528_v26  ;;  %437 = vst.msk [vmem:[#allocation2 + $0x20] sm:$0xff] %vm185_vm11, %v435_v28  ;;  %v316_v31 = vpop.permute.xlu1 %315 }
  0x94   :  { %866 = vmatmul.mubr.bf16.vlgmr.msra.gmra.mrb[0].mxu1 %v527_v27  ;;  %v529_v30 = vld [vmem:[#allocation2 + $0x10] sm:$0xff]  ;;  %318 = vst.msk [vmem:[#allocation2 + $0x18] sm:$0xff] %vm55_vm13, %v316_v31 }
  0x95   :  { %919 = vmatmul.mubr.bf16.vlgmr.msra.gmra.mrb[0].mxu0 %v529_v30 }
  0x96   :  { %928 = vmatprep.mubr.bf16.mxu0 %v1224_v40  ;;  %v467_v32 = vpop.permute.xlu0 %466 }
  0x97   :  { %469 = vst.msk [vmem:[#allocation2 + $0x20] sm:$0xff] %vm219_vm12, %v467_v32  ;;  %v334_v33 = vpop.permute.xlu1 %333 }
  0x98   :  { %336 = vst.msk [vmem:[#allocation2 + $0x18] sm:$0xff] %vm75_vm14, %v334_v33 }
  0x9a   :  { %v478_v34 = vpop.permute.xlu0 %477 }
  0x9b   :  { %480 = vst.msk [vmem:[#allocation2 + $0x20] sm:$0xff] %vm231_vm15, %v478_v34  ;;  %v366_v35 = vpop.permute.xlu1 %365 }
  0x9c   :  { %368 = vst.msk [vmem:[#allocation2 + $0x18] sm:$0xff] %vm109_vm0, %v366_v35 }
  0x9d   :  { %386 = vst.msk [vmem:[#allocation2 + $0x18] sm:$0xff] %vm129_vm3, %v384_v25 }
  0x9e   :  { %v505_v36 = vpop.permute.xlu0 %504 }
  0x9f   :  { %507 = vst.msk [vmem:[#allocation2 + $0x20] sm:$0xff] %vm259_vm1, %v505_v36  ;;  %v524_v37 = vpop.permute.xlu1 %523 }
  0xa0   :  { %508 = vst.msk [vmem:[#allocation2 + $0x28] sm:$0xff] %vm261_vm2, %v505_v36 }
  0xa1   :  { %526 = vst.msk [vmem:[#allocation2 + $0x28] sm:$0xff] %vm280_vm4, %v524_v37 }
  0xa4   :  { %v530_v39 = vld [vmem:[#allocation2 + $0x18] sm:$0xff] }
  0xa6   :  { %v531_v38 = vld [vmem:[#allocation2 + $0x20] sm:$0xff] }
  0xa7   :  { %875 = vmatprep.mubr.bf16.mxu1 %v531_v38 }
  0xa8   :  { %876 = vmatmul.mubr.bf16.gmra.mrb[4].mxu1 %v530_v39  ;;  %v532_v40 = vld [vmem:[#allocation2 + $0x28] sm:$0xff] }
  0xa9   :  { %929 = vmatmul.mubr.bf16.gmra.mrb[4].mxu0 %v532_v40 }
 0x167   :  { %v867_v48 = vpop.f32.mrb[0].mxu1 }
 0x168   :  { %v868_v49 = vadd.f32 %v867_v48, %v586_v46  ;;  %v869_v50 = vpop.f32.mrb[1].mxu1  ;;  %v920_v53 = vpop.f32.mrb[0].mxu0 }
 0x169   :  { %v870_v51 = vadd.f32 %v869_v50, %v590_v47  ;;  %v871_v52 = vpop.f32.mrb[2].mxu1  ;;  %v922_v57 = vpop.f32.mrb[1].mxu0 }
 0x16a   :  { %v872_v54 = vadd.f32 %v871_v52, %v586_v46  ;;  %v873_v55 = vpop.f32.mrb[3].mxu1  ;;  %v921_v56 = vadd.f32 %v920_v53, %v868_v49  ;;  %v924_v60 = vpop.f32.mrb[2].mxu0 }
 0x16b   :  { %v874_v58 = vadd.f32 %v873_v55, %v590_v47  ;;  %v923_v59 = vadd.f32 %v922_v57, %v870_v51  ;;  %v926_v62 = vpop.f32.mrb[3].mxu0 }
 0x16c   :  { %939 = vst [vmem:[%s1607_s3] sm:$0xff] %v921_v56  ;;  %v925_v61 = vadd.f32 %v924_v60, %v872_v54 }
 0x16d   :  { %940 = vst [vmem:[%s1607_s3 + $0x8] sm:$0xff] %v923_v59  ;;  %v927_v63 = vadd.f32 %v926_v62, %v874_v58 }
 0x16e   :  { %941 = vst [vmem:[%s1607_s3 + $0x10] sm:$0xff] %v925_v61 }
 0x16f   :  { %942 = vst [vmem:[%s1607_s3 + $0x18] sm:$0xff] %v927_v63 }
 0x17b   :  { %v877_v0 = vpop.f32.mrb[4].mxu1 }
 0x17c   :  { %v878_v1 = vadd.f32 %v877_v0, %v586_v46  ;;  %v879_v2 = vpop.f32.mrb[5].mxu1  ;;  %v930_v3 = vpop.f32.mrb[4].mxu0 }
 0x17d   :  { %v880_v4 = vadd.f32 %v879_v2, %v590_v47  ;;  %v881_v5 = vpop.f32.mrb[6].mxu1  ;;  %v932_v7 = vpop.f32.mrb[5].mxu0 }
 0x17e   :  { %v931_v6 = vadd.f32 %v930_v3, %v878_v1  ;;  %v882_v8 = vadd.f32 %v881_v5, %v586_v46  ;;  %v883_v9 = vpop.f32.mrb[7].mxu1  ;;  %v934_v11 = vpop.f32.mrb[6].mxu0 }
 0x17f   :  { %v933_v10 = vadd.f32 %v932_v7, %v880_v4  ;;  %v884_v12 = vadd.f32 %v883_v9, %v590_v47  ;;  %v936_v14 = vpop.f32.mrb[7].mxu0 }
 0x180   :  { %1071 = vst [vmem:[%s1607_s3 + $0x20] sm:$0xff] %v931_v6  ;;  %v935_v13 = vadd.f32 %v934_v11, %v882_v8 }
 0x181   :  { %1072 = vst [vmem:[%s1607_s3 + $0x28] sm:$0xff] %v933_v10  ;;  %v937_v15 = vadd.f32 %v936_v14, %v884_v12 }
 0x182   :  { %1073 = vst [vmem:[%s1607_s3 + $0x30] sm:$0xff] %v935_v13 }
 0x183   :  { %1074 = vst [vmem:[%s1607_s3 + $0x38] sm:$0xff] %v937_v15 }

</bundles_post_ra>
